<compile_context>
chip_gen: v6e
topology: v6e:2x2x1
jax: 0.10.0
libtpu: 0.0.40
codegen_flags: <defaults>
</compile_context>

<pallas_src>
import math

import jax
import jax.numpy as jnp
from jax.experimental import pallas as pl
from jax.experimental.pallas import tpu as pltpu


def _round_up(x, m):
    return (x + m - 1) // m * m


# ----------------------------------------------------------------------------
# Kernel: one (TM, ...) row tile — cos embedding, QuantizedQuantileLayer
# (Linear->PReLU->Linear), input modulation, output Linear->PReLU, and the
# sublane-packed transposed projection heads.
# ----------------------------------------------------------------------------
def iqn_kernel(slopes_ref,                     # SMEM (2,)  f32: PReLU slopes
               freq_ref,                       # (1, C)     f32: k * pi
               tau_ref,                        # (TM, 1)    f32
               x_ref,                          # (TM, F)    f32
               w1_ref, b1_ref,                 # Linear(C,C): (C,C) bf16 / (1,C) f32
               w2_ref, b2_ref,                 # Linear(C,F): (C,F) bf16 / (1,F) f32
               w3_ref, b3_ref,                 # Linear(F,F): (F,F) bf16 / (1,F) f32
               wp_ref, bp_ref,                 # heads: (Ksub,F) bf16 / (Ksub,1) f32
               out_ref):                       # (Ksub, TM) f32
    a1 = slopes_ref[0]
    a2 = slopes_ref[1]

    # --- QuantizedQuantileLayer ---------------------------------------------
    tau = tau_ref[...]                                        # (TM, 1) f32
    cos_emb = jnp.cos(tau * freq_ref[...])                    # (TM, C) f32

    # Linear(C, C) + PReLU (single shared slope)
    h1 = jnp.dot(cos_emb.astype(jnp.bfloat16), w1_ref[...],
                 preferred_element_type=jnp.float32) + b1_ref[...]
    h1 = jnp.where(h1 >= 0.0, h1, a1 * h1)

    # Linear(C, F) -> emb_taus
    emb_taus = jnp.dot(h1.astype(jnp.bfloat16), w2_ref[...],
                       preferred_element_type=jnp.float32) + b2_ref[...]

    # --- IQN head -------------------------------------------------------------
    # modulate the inputs; x stays f32, cast to bf16 exactly once for the matmul
    emb_inputs = x_ref[...] * (1.0 + emb_taus)                # (TM, F) f32

    # output layer: Linear(F, F) + PReLU
    h2 = jnp.dot(emb_inputs.astype(jnp.bfloat16), w3_ref[...],
                 preferred_element_type=jnp.float32) + b3_ref[...]
    h2 = jnp.where(h2 >= 0.0, h2, a2 * h2)

    # projection heads, sublane-packed & transposed:
    #   (Ksub, F) . (TM, F)^T  -> (Ksub, TM); stores stay lane-dense.
    proj = jax.lax.dot_general(
        wp_ref[...], h2.astype(jnp.bfloat16),
        dimension_numbers=(((1,), (1,)), ((), ())),
        preferred_element_type=jnp.float32)
    out_ref[...] = proj + bp_ref[...]


# ----------------------------------------------------------------------------
# Wrapper: flatten batch dims (no padding, no host-side casts of the big
# activation stream), set up BlockSpecs & grid, slice per-head outputs.
# ----------------------------------------------------------------------------
def iqn_forward(inputs, taus, params, *, tile_m=1024):
    """inputs: (..., F) f32, taus: inputs.shape[:-1] f32 -> tuple of per-head (...,)."""
    F_dim = inputs.shape[-1]
    lead = inputs.shape[:-1]
    N = math.prod(lead) if lead else 1

    C = params["freq"].shape[1]
    Ksub = params["wp8"].shape[0]       # heads padded to a multiple of 8 sublanes
    K = params["num_heads"]

    x = inputs.reshape(N, F_dim).astype(jnp.float32)   # reshape is free; no bf16 pass
    tau = taus.reshape(N, 1).astype(jnp.float32)

    # Row tile.  Single step when N fits; otherwise a multiple of 128 so the
    # transposed (Ksub, tm) output block keeps unmasked, lane-dense stores.
    # Tuning: v5e/v6e (single TensorCore) -> tile_m up to 2048; v7x -> keep at
    # least 2*num_cores grid steps so the "parallel" axis balances both TCs.
    if N <= tile_m:
        tm = N
    else:
        tm = max(128, (int(tile_m) // 128) * 128)
    grid = (pl.cdiv(N, tm),)            # ragged last block: Pallas masks the edge

    full = lambda shape: pl.BlockSpec(shape, lambda i: (0,) * len(shape))
    rows = lambda last: pl.BlockSpec((tm, last), lambda i: (i, 0))

    out = pl.pallas_call(
        iqn_kernel,
        out_shape=jax.ShapeDtypeStruct((Ksub, N), jnp.float32),
        grid=grid,
        in_specs=[
            pl.BlockSpec(memory_space=pltpu.MemorySpace.SMEM),  # slopes (2,)
            full((1, C)),             # freq  (k * pi)
            rows(1),                  # tau   (N, 1) f32
            rows(F_dim),              # x     (N, F) f32
            full((C, C)),             # w1    bf16
            full((1, C)),             # b1
            full((C, F_dim)),         # w2    bf16
            full((1, F_dim)),         # b2
            full((F_dim, F_dim)),     # w3    bf16
            full((1, F_dim)),         # b3
            full((Ksub, F_dim)),      # wp8   bf16 (heads sublane-packed, transposed)
            full((Ksub, 1)),          # bp8   f32
        ],
        out_specs=pl.BlockSpec((Ksub, tm), lambda i: (0, i)),
        compiler_params=pltpu.CompilerParams(
            dimension_semantics=("parallel",)),
    )(params["slopes"], params["freq"], tau, x,
      params["w1"], params["b1"], params["w2"], params["b2"],
      params["w3"], params["b3"], params["wp8"], params["bp8"])

    heads = out[:K, :].reshape((K,) + lead)     # each head: Linear(F,1).squeeze(-1)
    return tuple(heads[k] for k in range(K))


# domain_map (identity; lag-llama supplies it externally)
def domain_map(*args):
    return args


# ----------------------------------------------------------------------------
# Parameters: raw f32 (for the pure-JAX reference) + kernel-ready preparation.
# ----------------------------------------------------------------------------
def make_raw_params(key, in_features, cos_embedding_dim, args_dims):
    Fd, C = in_features, cos_embedding_dim
    K = len(args_dims)
    assert all(d == 1 for d in args_dims), "heads are Linear(F, 1) + squeeze(-1)"
    ks = jax.random.split(key, 8)
    scale = 0.02
    return {
        # QuantizedQuantileLayer.output_layer
        "w1": scale * jax.random.normal(ks[0], (C, C), jnp.float32),   # Linear(C,C)
        "b1": 0.01 * jax.random.normal(ks[1], (1, C), jnp.float32),
        "a1": jnp.full((1, 1), 0.25, jnp.float32),                     # PReLU init
        "w2": scale * jax.random.normal(ks[2], (C, Fd), jnp.float32),  # Linear(C,F)
        "b2": 0.01 * jax.random.normal(ks[3], (1, Fd), jnp.float32),
        # QuantizedImplicitQuantileModule.output_layer
        "w3": scale * jax.random.normal(ks[4], (Fd, Fd), jnp.float32), # Linear(F,F)
        "b3": 0.01 * jax.random.normal(ks[5], (1, Fd), jnp.float32),
        "a2": jnp.full((1, 1), 0.25, jnp.float32),                     # PReLU init
        # projection heads (each Linear(F, 1)), stacked as (F, K)
        "wp": scale * jax.random.normal(ks[6], (Fd, K), jnp.float32),
        "bp": 0.01 * jax.random.normal(ks[7], (1, K), jnp.float32),
    }


def prepare_params(raw):
    """bf16 matmul weights, sublane-packed transposed heads, packed scalars."""
    C = raw["w1"].shape[0]
    Fd = raw["w3"].shape[0]
    K = raw["wp"].shape[1]
    Ksub = _round_up(max(K, 1), 8)      # pad heads to 8 SUBLANES (not 128 lanes)

    wp8 = jnp.zeros((Ksub, Fd), jnp.float32).at[:K, :].set(raw["wp"].T)
    bp8 = jnp.zeros((Ksub, 1), jnp.float32).at[:K, 0].set(raw["bp"][0])
    freq = (jnp.arange(C, dtype=jnp.float32) * jnp.float32(math.pi)).reshape(1, C)
    slopes = jnp.concatenate(
        [raw["a1"].reshape(1), raw["a2"].reshape(1)]).astype(jnp.float32)

    return {
        "slopes": slopes,
        "freq": freq,
        "w1": raw["w1"].astype(jnp.bfloat16), "b1": raw["b1"].astype(jnp.float32),
        "w2": raw["w2"].astype(jnp.bfloat16), "b2": raw["b2"].astype(jnp.float32),
        "w3": raw["w3"].astype(jnp.bfloat16), "b3": raw["b3"].astype(jnp.float32),
        "wp8": wp8.astype(jnp.bfloat16),      "bp8": bp8,
        "num_heads": K,
    }


# Pure-JAX f32 reference (mirrors the PyTorch forward) for a correctness check.
def iqn_reference(inputs, taus, raw):
    C = raw["w1"].shape[0]
    K = raw["wp"].shape[1]
    k = jnp.arange(C, dtype=jnp.float32)
    cos_emb = jnp.cos(taus[..., None] * k * jnp.float32(math.pi))
    h1 = cos_emb @ raw["w1"] + raw["b1"]
    h1 = jnp.where(h1 >= 0.0, h1, raw["a1"] * h1)
    emb_taus = h1 @ raw["w2"] + raw["b2"]
    emb_inputs = inputs * (1.0 + emb_taus)
    h2 = emb_inputs @ raw["w3"] + raw["b3"]
    h2 = jnp.where(h2 >= 0.0, h2, raw["a2"] * h2)
    out = h2 @ raw["wp"] + raw["bp"]
    return tuple(out[..., i] for i in range(K))


if __name__ == "__main__":
    # Small shapes consistent with the module: batch=2, seq=8, in_features=32,
    # cos_embedding_dim=64, args_dim = {"loc": 1, "scale": 1}.
    B, T, F_dim, C = 2, 8, 32, 64
    args_dim = {"loc": 1, "scale": 1}

    key = jax.random.PRNGKey(0)
    k_in, k_tau, k_par, k_in2, k_tau2 = jax.random.split(key, 5)

    inputs = jax.random.normal(k_in, (B, T, F_dim), jnp.float32)
    # eval-mode path of the module: taus = torch.rand(inputs.shape[:-1])
    # TODO(synk): training-mode Beta(c1, c0) tau sampling stays outside the
    # kernel (pure host RNG); with c1 = c0 = 1.0 it equals Uniform anyway.
    taus = jax.random.uniform(k_tau, (B, T), jnp.float32)

    raw = make_raw_params(k_par, F_dim, C, tuple(args_dim.values()))
    kparams = prepare_params(raw)

    head_outputs = iqn_forward(inputs, taus, kparams)
    result = (*domain_map(*head_outputs), taus)
    for r in result:
        jax.block_until_ready(r)

    # shape + numerical sanity check (bf16 matmuls => loose tolerance).
    ref = iqn_reference(inputs, taus, raw)
    assert all(h.shape == (B, T) for h in head_outputs)
    assert result[-1].shape == (B, T)
    max_err = max(float(jnp.max(jnp.abs(h - r))) for h, r in zip(head_outputs, ref))
    assert max_err < 5e-2, f"max abs err {max_err}"

    # Second check: multi-step grid with a ragged last block (no host padding).
    # N = 2*160 = 320 rows, tile 256 -> grid (2,) with a 64-row masked tail.
    B2, T2 = 2, 160
    inputs2 = jax.random.normal(k_in2, (B2, T2, F_dim), jnp.float32)
    taus2 = jax.random.uniform(k_tau2, (B2, T2), jnp.float32)
    heads2 = iqn_forward(inputs2, taus2, kparams, tile_m=256)
    for h in heads2:
        jax.block_until_ready(h)
    ref2 = iqn_reference(inputs2, taus2, raw)
    assert all(h.shape == (B2, T2) for h in heads2)
    max_err2 = max(float(jnp.max(jnp.abs(h - r))) for h, r in zip(heads2, ref2))
    assert max_err2 < 5e-2, f"max abs err {max_err2}"

    print("KERNEL_OK")
</pallas_src>

<mosaic_0001>
module attributes {stable_mosaic.version = 11 : i64} {
  func.func @iqn_kernel(%arg0: i32, %arg1: memref<2xf32, #tpu.memory_space<smem>>, %arg2: memref<1x64xf32, #tpu.memory_space<vmem>>, %arg3: memref<16x1xf32, #tpu.memory_space<vmem>>, %arg4: memref<16x32xf32, #tpu.memory_space<vmem>>, %arg5: memref<64x64xbf16, #tpu.memory_space<vmem>>, %arg6: memref<1x64xf32, #tpu.memory_space<vmem>>, %arg7: memref<64x32xbf16, #tpu.memory_space<vmem>>, %arg8: memref<1x32xf32, #tpu.memory_space<vmem>>, %arg9: memref<32x32xbf16, #tpu.memory_space<vmem>>, %arg10: memref<1x32xf32, #tpu.memory_space<vmem>>, %arg11: memref<8x32xbf16, #tpu.memory_space<vmem>>, %arg12: memref<8x1xf32, #tpu.memory_space<vmem>>, %arg13: memref<8x16xf32, #tpu.memory_space<vmem>>) attributes {dimension_semantics = [#tpu.dimension_semantics<parallel>], iteration_bounds = array<i64: 1>, scalar_prefetch = 0 : i64, scratch_operands = 0 : i64, tpu.core_type = #tpu.core_type<tc>, window_params = [{transform_indices = @transform_0, window_bounds = array<i64: 2>}, {pipeline_mode = #tpu.pipeline_mode<synchronous>, transform_indices = @transform_1, window_bounds = array<i64: 1, 64>}, {transform_indices = @transform_2, window_bounds = array<i64: 16, 1>}, {transform_indices = @transform_3, window_bounds = array<i64: 16, 32>}, {pipeline_mode = #tpu.pipeline_mode<synchronous>, transform_indices = @transform_4, window_bounds = array<i64: 64, 64>}, {pipeline_mode = #tpu.pipeline_mode<synchronous>, transform_indices = @transform_5, window_bounds = array<i64: 1, 64>}, {pipeline_mode = #tpu.pipeline_mode<synchronous>, transform_indices = @transform_6, window_bounds = array<i64: 64, 32>}, {pipeline_mode = #tpu.pipeline_mode<synchronous>, transform_indices = @transform_7, window_bounds = array<i64: 1, 32>}, {pipeline_mode = #tpu.pipeline_mode<synchronous>, transform_indices = @transform_8, window_bounds = array<i64: 32, 32>}, {pipeline_mode = #tpu.pipeline_mode<synchronous>, transform_indices = @transform_9, window_bounds = array<i64: 1, 32>}, {pipeline_mode = #tpu.pipeline_mode<synchronous>, transform_indices = @transform_10, window_bounds = array<i64: 8, 32>}, {pipeline_mode = #tpu.pipeline_mode<synchronous>, transform_indices = @transform_11, window_bounds = array<i64: 8, 1>}, {transform_indices = @transform_12, window_bounds = array<i64: 8, 16>}]} {
    %c0 = arith.constant 0 : index
    %0 = memref.load %arg1[%c0] : memref<2xf32, #tpu.memory_space<smem>>
    %c1 = arith.constant 1 : index
    %1 = memref.load %arg1[%c1] : memref<2xf32, #tpu.memory_space<smem>>
    %c0_0 = arith.constant 0 : index
    %c0_1 = arith.constant 0 : index
    %2 = vector.load %arg3[%c0_0, %c0_1] : memref<16x1xf32, #tpu.memory_space<vmem>>, vector<16x1xf32>
    %c0_2 = arith.constant 0 : index
    %c0_3 = arith.constant 0 : index
    %3 = vector.load %arg2[%c0_2, %c0_3] : memref<1x64xf32, #tpu.memory_space<vmem>>, vector<1x64xf32>
    %4 = vector.broadcast %2 : vector<16x1xf32> to vector<16x64xf32>
    %5 = vector.broadcast %3 : vector<1x64xf32> to vector<16x64xf32>
    %6 = arith.mulf %4, %5 : vector<16x64xf32>
    %7 = math.cos %6 : vector<16x64xf32>
    %8 = arith.truncf %7 : vector<16x64xf32> to vector<16x64xbf16>
    %c0_4 = arith.constant 0 : index
    %c0_5 = arith.constant 0 : index
    %9 = vector.load %arg5[%c0_4, %c0_5] : memref<64x64xbf16, #tpu.memory_space<vmem>>, vector<64x64xbf16>
    %cst = arith.constant dense<0.000000e+00> : vector<16x64xf32>
    %10 = tpu.matmul %8, %9, %cst {dimension_numbers = #tpu.dot_dimension_numbers<[1], [0], [0], [1], [0, 0, 1, 1], [], []>} : vector<16x64xbf16>, vector<64x64xbf16>, vector<16x64xf32> -> vector<16x64xf32>
    %c0_6 = arith.constant 0 : index
    %c0_7 = arith.constant 0 : index
    %11 = vector.load %arg6[%c0_6, %c0_7] : memref<1x64xf32, #tpu.memory_space<vmem>>, vector<1x64xf32>
    %12 = vector.broadcast %11 : vector<1x64xf32> to vector<16x64xf32>
    %13 = arith.addf %10, %12 : vector<16x64xf32>
    %cst_8 = arith.constant 0.000000e+00 : f32
    %14 = vector.broadcast %cst_8 : f32 to vector<16x64xf32>
    %15 = arith.cmpf oge, %13, %14 : vector<16x64xf32>
    %16 = vector.broadcast %0 : f32 to vector<16x64xf32>
    %17 = arith.mulf %16, %13 : vector<16x64xf32>
    %18 = arith.select %15, %13, %17 : vector<16x64xi1>, vector<16x64xf32>
    %19 = arith.truncf %18 : vector<16x64xf32> to vector<16x64xbf16>
    %c0_9 = arith.constant 0 : index
    %c0_10 = arith.constant 0 : index
    %20 = vector.load %arg7[%c0_9, %c0_10] : memref<64x32xbf16, #tpu.memory_space<vmem>>, vector<64x32xbf16>
    %cst_11 = arith.constant dense<0.000000e+00> : vector<16x32xf32>
    %21 = tpu.matmul %19, %20, %cst_11 {dimension_numbers = #tpu.dot_dimension_numbers<[1], [0], [0], [1], [0, 0, 1, 1], [], []>} : vector<16x64xbf16>, vector<64x32xbf16>, vector<16x32xf32> -> vector<16x32xf32>
    %c0_12 = arith.constant 0 : index
    %c0_13 = arith.constant 0 : index
    %22 = vector.load %arg8[%c0_12, %c0_13] : memref<1x32xf32, #tpu.memory_space<vmem>>, vector<1x32xf32>
    %23 = vector.broadcast %22 : vector<1x32xf32> to vector<16x32xf32>
    %24 = arith.addf %21, %23 : vector<16x32xf32>
    %c0_14 = arith.constant 0 : index
    %c0_15 = arith.constant 0 : index
    %25 = vector.load %arg4[%c0_14, %c0_15] : memref<16x32xf32, #tpu.memory_space<vmem>>, vector<16x32xf32>
    %cst_16 = arith.constant 1.000000e+00 : f32
    %26 = vector.broadcast %cst_16 : f32 to vector<16x32xf32>
    %27 = arith.addf %26, %24 : vector<16x32xf32>
    %28 = arith.mulf %25, %27 : vector<16x32xf32>
    %29 = arith.truncf %28 : vector<16x32xf32> to vector<16x32xbf16>
    %c0_17 = arith.constant 0 : index
    %c0_18 = arith.constant 0 : index
    %30 = vector.load %arg9[%c0_17, %c0_18] : memref<32x32xbf16, #tpu.memory_space<vmem>>, vector<32x32xbf16>
    %cst_19 = arith.constant dense<0.000000e+00> : vector<16x32xf32>
    %31 = tpu.matmul %29, %30, %cst_19 {dimension_numbers = #tpu.dot_dimension_numbers<[1], [0], [0], [1], [0, 0, 1, 1], [], []>} : vector<16x32xbf16>, vector<32x32xbf16>, vector<16x32xf32> -> vector<16x32xf32>
    %c0_20 = arith.constant 0 : index
    %c0_21 = arith.constant 0 : index
    %32 = vector.load %arg10[%c0_20, %c0_21] : memref<1x32xf32, #tpu.memory_space<vmem>>, vector<1x32xf32>
    %33 = vector.broadcast %32 : vector<1x32xf32> to vector<16x32xf32>
    %34 = arith.addf %31, %33 : vector<16x32xf32>
    %cst_22 = arith.constant 0.000000e+00 : f32
    %35 = vector.broadcast %cst_22 : f32 to vector<16x32xf32>
    %36 = arith.cmpf oge, %34, %35 : vector<16x32xf32>
    %37 = vector.broadcast %1 : f32 to vector<16x32xf32>
    %38 = arith.mulf %37, %34 : vector<16x32xf32>
    %39 = arith.select %36, %34, %38 : vector<16x32xi1>, vector<16x32xf32>
    %c0_23 = arith.constant 0 : index
    %c0_24 = arith.constant 0 : index
    %40 = vector.load %arg11[%c0_23, %c0_24] : memref<8x32xbf16, #tpu.memory_space<vmem>>, vector<8x32xbf16>
    %41 = arith.truncf %39 : vector<16x32xf32> to vector<16x32xbf16>
    %cst_25 = arith.constant dense<0.000000e+00> : vector<8x16xf32>
    %42 = tpu.matmul %40, %41, %cst_25 {dimension_numbers = #tpu.dot_dimension_numbers<[1], [1], [0], [0], [0, 0, 1, 0], [], []>} : vector<8x32xbf16>, vector<16x32xbf16>, vector<8x16xf32> -> vector<8x16xf32>
    %c0_26 = arith.constant 0 : index
    %c0_27 = arith.constant 0 : index
    %43 = vector.load %arg12[%c0_26, %c0_27] : memref<8x1xf32, #tpu.memory_space<vmem>>, vector<8x1xf32>
    %44 = vector.broadcast %43 : vector<8x1xf32> to vector<8x16xf32>
    %45 = arith.addf %42, %44 : vector<8x16xf32>
    %c0_28 = arith.constant 0 : index
    %c0_29 = arith.constant 0 : index
    %46 = vector.load %arg13[%c0_28, %c0_29] : memref<8x16xf32, #tpu.memory_space<vmem>>, vector<8x16xf32>
    tpu.vector_store %arg13[%c0_28, %c0_29], %45 {strides = array<i32>} : memref<8x16xf32, #tpu.memory_space<vmem>>, vector<8x16xf32>,
    return
  }
  func.func @transform_0(%arg0: i32) -> i32 {
    %c0_i32 = arith.constant 0 : i32
    %c0_i32_0 = arith.constant 0 : i32
    return %c0_i32 : i32
  }
  func.func @transform_1(%arg0: i32) -> (i32, i32) {
    %c0_i32 = arith.constant 0 : i32
    %c0_i32_0 = arith.constant 0 : i32
    %c0_i32_1 = arith.constant 0 : i32
    return %c0_i32, %c0_i32_0 : i32, i32
  }
  func.func @transform_2(%arg0: i32) -> (i32, i32) {
    %c0_i32 = arith.constant 0 : i32
    %c0_i32_0 = arith.constant 0 : i32
    return %arg0, %c0_i32 : i32, i32
  }
  func.func @transform_3(%arg0: i32) -> (i32, i32) {
    %c0_i32 = arith.constant 0 : i32
    %c0_i32_0 = arith.constant 0 : i32
    return %arg0, %c0_i32 : i32, i32
  }
  func.func @transform_4(%arg0: i32) -> (i32, i32) {
    %c0_i32 = arith.constant 0 : i32
    %c0_i32_0 = arith.constant 0 : i32
    %c0_i32_1 = arith.constant 0 : i32
    return %c0_i32, %c0_i32_0 : i32, i32
  }
  func.func @transform_5(%arg0: i32) -> (i32, i32) {
    %c0_i32 = arith.constant 0 : i32
    %c0_i32_0 = arith.constant 0 : i32
    %c0_i32_1 = arith.constant 0 : i32
    return %c0_i32, %c0_i32_0 : i32, i32
  }
  func.func @transform_6(%arg0: i32) -> (i32, i32) {
    %c0_i32 = arith.constant 0 : i32
    %c0_i32_0 = arith.constant 0 : i32
    %c0_i32_1 = arith.constant 0 : i32
    return %c0_i32, %c0_i32_0 : i32, i32
  }
  func.func @transform_7(%arg0: i32) -> (i32, i32) {
    %c0_i32 = arith.constant 0 : i32
    %c0_i32_0 = arith.constant 0 : i32
    %c0_i32_1 = arith.constant 0 : i32
    return %c0_i32, %c0_i32_0 : i32, i32
  }
  func.func @transform_8(%arg0: i32) -> (i32, i32) {
    %c0_i32 = arith.constant 0 : i32
    %c0_i32_0 = arith.constant 0 : i32
    %c0_i32_1 = arith.constant 0 : i32
    return %c0_i32, %c0_i32_0 : i32, i32
  }
  func.func @transform_9(%arg0: i32) -> (i32, i32) {
    %c0_i32 = arith.constant 0 : i32
    %c0_i32_0 = arith.constant 0 : i32
    %c0_i32_1 = arith.constant 0 : i32
    return %c0_i32, %c0_i32_0 : i32, i32
  }
  func.func @transform_10(%arg0: i32) -> (i32, i32) {
    %c0_i32 = arith.constant 0 : i32
    %c0_i32_0 = arith.constant 0 : i32
    %c0_i32_1 = arith.constant 0 : i32
    return %c0_i32, %c0_i32_0 : i32, i32
  }
  func.func @transform_11(%arg0: i32) -> (i32, i32) {
    %c0_i32 = arith.constant 0 : i32
    %c0_i32_0 = arith.constant 0 : i32
    %c0_i32_1 = arith.constant 0 : i32
    return %c0_i32, %c0_i32_0 : i32, i32
  }
  func.func @transform_12(%arg0: i32) -> (i32, i32) {
    %c0_i32 = arith.constant 0 : i32
    %c0_i32_0 = arith.constant 0 : i32
    return %c0_i32, %arg0 : i32, i32
  }
}

</mosaic_0001>

<bundles_post_ra>
// kernel: tpu_custom_call.1
= control target key start
LH: loop header
LB: loop body
LE: loop exit
PB: predicated region body
PF: predicated region fallthrough
CT: control target
= control target key end

     0   :  { %17 = vsyncpa [#allocation5], 0  ;;  %s1080_s0 = inlined_call_operand.hbm [shape: f32[2], index: 0, kind: input, shape index: {}]   ;;  %s1081_s1 = inlined_call_operand.hbm [shape: f32[1,64], index: 1, kind: input, shape index: {}]   ;;  %s1082_s2 = inlined_call_operand.vmem [shape: f32[16,1], index: 2, kind: input, shape index: {}]   ;;  %s1083_s3 = inlined_call_operand.vmem [shape: f32[16,32], index: 3, kind: input, shape index: {}]   ;;  %s1084_s4 = inlined_call_operand.vmem [shape: bf16[64,64], index: 4, kind: input, shape index: {}]   ;;  %s1085_s5 = inlined_call_operand.hbm [shape: f32[1,64], index: 5, kind: input, shape index: {}]   ;;  %s1086_s6 = inlined_call_operand.vmem [shape: bf16[64,32], index: 6, kind: input, shape index: {}]   ;;  %s1087_s7 = inlined_call_operand.vmem [shape: f32[1,32], index: 7, kind: input, shape index: {}]   ;;  %s1088_s8 = inlined_call_operand.vmem [shape: bf16[32,32], index: 8, kind: input, shape index: {}]   ;;  %s1089_s9 = inlined_call_operand.vmem [shape: f32[1,32], index: 9, kind: input, shape index: {}]   ;;  %s1090_s10 = inlined_call_operand.vmem [shape: bf16[8,32], index: 10, kind: input, shape index: {}]   ;;  %s1091_s11 = inlined_call_operand.vmem [shape: f32[8,1], index: 11, kind: input, shape index: {}]   ;;  %s1092_s12 = inlined_call_operand.hbm [shape: f32[8,16], index: 12, kind: output, shape index: {}]  }
   0x1   :  { %18 = vsyncpa [#allocation3], 0 }
   0x2   :  { %19 = vsyncpa [#allocation8], 0 }
   0x3   :  { %20 = vsyncpa [#allocation4], 0  ;;  %s835_s21 = smov [#allocation2]   ;;  %s836_s24 = smov [#allocation6]  }
   0x4   :  { %28 = dma.hbm_to_smem %s1080_s0, 16, %s835_s21, [#allocation5]  }
   0x5   :  { %s35_s25 = sshll.u32 %s836_s24, 4  ;;  %s837_s26 = smov [#allocation7]   ;;  %s36_s25 = int_to_ptr.vmem [resolvable:$true] %s35_s25 }
   0x6   :  { %s51_s27 = sshll.u32 %s837_s26, 4  ;;  %s775_s28 = scalar_lea.vmem %s36_s25, 16  ;;  %s52_s27 = int_to_ptr.vmem [resolvable:$true] %s51_s27 }
   0x7   :  { %p776_p0 = scmp.ne.s32.totalorder %s36_s25, %s775_s28  ;;  %s779_s29 = scalar_lea.vmem %s36_s25, 32 }
   0x8   :  { %p780_p1 = scmp.lt.s32.totalorder %s36_s25, %s36_s25  ;;  %p781_p2 = scmp.lt.s32.totalorder %s779_s29, %s775_s28 }
   0xa   :  { %p782_p3 = por %p781_p2, %p780_p1 }
   0xc   :  { %p783_p4 = pnand %p782_p3, %p776_p0 }
   0xe   :  { %786 = shalt.err (!%p783_p4)
}
   0xf   :  { %38 = dma.hbm_to_vmem [thread:$0]  %s1081_s1, 16, %s36_s25, [#allocation3]  }
  0x10   :  { %s795_s14 = scalar_lea.vmem %s52_s27, 16  ;;  %s799_s0 = scalar_lea.vmem %s52_s27, 32 }
  0x11   :  { %p796_p5 = scmp.ne.s32.totalorder %s52_s27, %s795_s14  ;;  %p800_p6 = scmp.lt.s32.totalorder %s52_s27, %s52_s27 }
  0x12   :  { %p801_p7 = scmp.lt.s32.totalorder %s799_s0, %s795_s14 }
  0x14   :  { %p802_p8 = por %p801_p7, %p800_p6 }
  0x16   :  { %p803_p9 = pnand %p802_p8, %p796_p5 }
  0x18   :  { %806 = shalt.err (!%p803_p9)
}
  0x19   :  { %54 = dma.hbm_to_vmem [thread:$0]  %s1085_s5, 16, %s52_s27, [#allocation8]  }
  0x1a   :  { %827 = dma.done.wait [#allocation5], 16  }
  0x1b   :  { %828 = vsyncadd [#allocation5], 4294967280 }
  0x1c   :  { %829 = dma.done.wait [#allocation3], 16  }
  0x1d   :  { %830 = vsyncadd [#allocation3], 4294967280 }
  0x1e   :  { %831 = dma.done.wait [#allocation8], 16  }
  0x1f   :  { %832 = vsyncadd [#allocation8], 4294967280 }
  0x20   :  { %76 = sfence }
  0x21   :  { %v80_v0 = vld [vmem:[%s1082_s2] sm:$0xff]  ;;  %v838_v1 = vmov 0   ;;  %v81_v2 = vld [vmem:[%s1082_s2 + $0x8] sm:$0xff]  ;;  %v741_v3 = vld [vmem:[%s1084_s4 + $0x18] sm:$0xff]   ;;  %v839_v4 = vmov 0.0   ;;  %vm840_vm0 = vmmov 0  }
  0x22   :  { %739 = vset.pattern.permute.xlu0 %v838_v1  ;;  %740 = vset.pattern.permute.xlu1 %v838_v1  ;;  %v742_v5 = vld [vmem:[%s1084_s4 + $0x10] sm:$0xff]   ;;  %v743_v6 = vld [vmem:[%s1084_s4 + $0x8] sm:$0xff]   ;;  %v744_v7 = vld [vmem:[%s1084_s4] sm:$0xff]   ;;  %v841_v30 = vmov 683565275   ;;  %s78_s0 = sld [smem:[#allocation2]] }
  0x23   :  { %85 = vperm.xlu0 %739, %v80_v0   ;;  %680 = vmatprep.subr.bf16.mxu0 %v839_v4  ;;  %v745_v8 = vld [vmem:[%s1086_s6 + $0x18] sm:$0xff]   ;;  %v639_v9 = vld [vmem:[#allocation6] ss:$0 sm:$0xff]  ;;  %v842_v34 = vmov 2475754826   ;;  %s638_s22 = sld [smem:[#allocation2 + $0x1]] }
  0x24   :  { %688 = vmatprep.mubr.msk.bf16.mxu0 %vm840_vm0, %v839_v4  ;;  %681 = vmatpush3.bf16.msra.mxu0 %v741_v3  ;;  %v843_v36 = vmov 2131351028   ;;  %v844_v38 = vmov 2102212464   ;;  %v845_v40 = vmov 920167782  }
  0x25   :  { %692 = vmatprep.subr.bf16.mxu1 %v839_v4  ;;  %682 = vmatprep.subr.bf16.mxu0 %v839_v4  ;;  %v846_v47 = vmov 1326507024  }
  0x26   :  { %700 = vmatprep.mubr.msk.bf16.mxu1 %vm840_vm0, %v839_v4  ;;  %693 = vmatpush3.bf16.msra.mxu1 %v745_v8 }
  0x27   :  { %90 = vperm.xlu0 %739, %v81_v2   ;;  %694 = vmatprep.subr.bf16.mxu1 %v839_v4 }
  0x28   :  { %683 = vmatpush3.bf16.msra.mxu0 %v742_v5 }
  0x29   :  { %684 = vmatprep.subr.bf16.mxu0 %v839_v4 }
  0x2c   :  { %685 = vmatpush3.bf16.msra.mxu0 %v743_v6 }
  0x2d   :  { %686 = vmatprep.subr.bf16.mxu0 %v839_v4 }
  0x30   :  { %687 = vmatpush3.bf16.msra.mxu0 %v744_v7 }
  0x31   :  { %704 = vmatprep.subr.bf16.mxu0 %v839_v4 }
  0x9e   :  { %v86_v10 = vpop.permute.xlu0 %85 }
  0x9f   :  { %v954_v11 = vmul.f32 %v639_v9, %v86_v10 }
  0xa1   :  { %v101_v12 = vand.u32 2147483647, %v954_v11  ;;  %v104_v13 = vand.u32 2139095040, %v954_v11  ;;  %vm103_vm15 = vcmp.lt.s32.totalorder %v954_v11, 0 }
  0xa2   :  { %v91_v14 = vpop.permute.xlu0 %90 }
  0xa3   :  { %v105_v15 = vshrl.u32 %v104_v13, 23  ;;  %v958_v16 = vmul.f32 %v639_v9, %v91_v14  ;;  %v108_v17 = vand.u32 8388607, %v101_v12 }
  0xa5   :  { %v640_v18 = vadd.s32 4294967169, %v105_v15  ;;  %v207_v19 = vand.u32 2139095040, %v958_v16  ;;  %v109_v21 = vor.u32 8388608, %v108_v17  ;;  %v204_v23 = vand.u32 2147483647, %v958_v16 }
  0xa7   :  { %v111_v20 = vadd.s32 1, %v640_v18  ;;  %v208_v22 = vshrl.u32 %v207_v19, 23  ;;  %v964_v28 = vshll.u32 %v109_v21, 8  ;;  %v211_v32 = vand.u32 8388607, %v204_v23 }
  0xa9   :  { %vm112_vm1 = vcmp.gt.s32.totalorder %v111_v20, 0  ;;  %v644_v25 = vadd.s32 4294967169, %v208_v22  ;;  %v212_v62 = vor.u32 8388608, %v211_v32 }
  0xaa   :  { %v113_v24 = vsel %vm112_vm1, %v111_v20, 0  ;;  %vm1012_vm1 = vcmp.le.f32.partialorder %v101_v12, 0.7853982 }
  0xab   :  { %v114_v26 = vshrl.u32 %v113_v24, 5  ;;  %v115_v27 = vand.u32 31, %v113_v24  ;;  %v214_v33 = vadd.s32 1, %v644_v25  ;;  %v252_v14 = vshll.u32 %v212_v62, 8 }
  0xad   :  { %v116_v29 = vsub.s32 32, %v115_v27  ;;  %v118_v31 = vshll.u32 %v841_v30, %v115_v27  ;;  %v121_v35 = vshll.u32 %v842_v34, %v115_v27  ;;  %v124_v37 = vshll.u32 %v843_v36, %v115_v27 }
  0xae   :  { %v127_v39 = vshll.u32 %v844_v38, %v115_v27  ;;  %v130_v41 = vshll.u32 %v845_v40, %v115_v27  ;;  %vm133_vm2 = vcmp.lt.s32.totalorder %v114_v26, 1  ;;  %vm135_vm3 = vcmp.lt.s32.totalorder %v114_v26, 3 }
  0xaf   :  { %v119_v42 = vshrl.u32 %v842_v34, %v116_v29  ;;  %v122_v43 = vshrl.u32 %v843_v36, %v116_v29  ;;  %v125_v44 = vshrl.u32 %v844_v38, %v116_v29  ;;  %v117_v45 = vshrl.u32 %v841_v30, %v116_v29 }
  0xb0   :  { %v128_v46 = vshrl.u32 %v845_v40, %v116_v29  ;;  %v131_v48 = vshrl.u32 %v846_v47, %v116_v29  ;;  %vm215_vm4 = vcmp.gt.s32.totalorder %v214_v33, 0  ;;  %vm136_vm5 = vcmp.lt.s32.totalorder %v114_v26, 4 }
  0xb1   :  { %v120_v49 = vor.u32 %v119_v42, %v118_v31  ;;  %v123_v50 = vor.u32 %v122_v43, %v121_v35  ;;  %v126_v51 = vor.u32 %v125_v44, %v124_v37  ;;  %v216_v54 = vsel %vm215_vm4, %v214_v33, 0 }
  0xb2   :  { %v129_v52 = vor.u32 %v128_v46, %v127_v39  ;;  %v132_v53 = vor.u32 %v131_v48, %v130_v41  ;;  %vm134_vm6 = vcmp.lt.s32.totalorder %v114_v26, 2  ;;  %v218_v1 = vand.u32 31, %v216_v54 }
  0xb3   :  { %v137_v55 = vsel %vm133_vm2, %v117_v45, %v120_v49  ;;  %v138_v56 = vsel %vm136_vm5, %v126_v51, 2102212464  ;;  %v141_v57 = vsel %vm133_vm2, %v120_v49, %v123_v50  ;;  %v145_v58 = vsel %vm133_vm2, %v123_v50, %v126_v51 }
  0xb4   :  { %v139_v59 = vsel %vm135_vm3, %v123_v50, %v138_v56  ;;  %v142_v60 = vsel %vm136_vm5, %v129_v52, 920167782  ;;  %v146_v61 = vsel %vm136_vm5, %v132_v53, 1326507024  ;;  %v217_v10 = vshrl.u32 %v216_v54, 5 }
  0xb5   :  { %v143_v63 = vsel %vm135_vm3, %v126_v51, %v142_v60  ;;  %v147_v0 = vsel %vm135_vm3, %v129_v52, %v146_v61  ;;  %v140_v2 = vsel %vm134_vm6, %v137_v55, %v139_v59  ;;  %v219_v13 = vsub.s32 32, %v218_v1 }
  0xb6   :  { %v144_v3 = vsel %vm134_vm6, %v141_v57, %v143_v63  ;;  %v148_v5 = vsel %vm134_vm6, %v145_v58, %v147_v0  ;;  %v156_v15 = vmul.u32 %v964_v28, %v140_v2  ;;  %v221_v17 = vshll.u32 %v841_v30, %v218_v1 }
  0xb7   :  { %v977_v6 = vmul.u32.u64.low %v964_v28, %v148_v5  ;;  %v978_v7 = vmul.u32.u64.high %v964_v28, %v148_v5, %v977_v6  ;;  %v981_v8 = vmul.u32.u64.low %v964_v28, %v144_v3  ;;  %v982_v9 = vmul.u32.u64.high %v964_v28, %v144_v3, %v981_v8 }
  0xb8   :  { %v224_v18 = vshll.u32 %v842_v34, %v218_v1  ;;  %v227_v19 = vshll.u32 %v843_v36, %v218_v1  ;;  %v222_v20 = vshrl.u32 %v842_v34, %v219_v13  ;;  %v225_v21 = vshrl.u32 %v843_v36, %v219_v13 }
  0xb9   :  { %v228_v22 = vshrl.u32 %v844_v38, %v219_v13  ;;  %v230_v24 = vshll.u32 %v844_v38, %v218_v1  ;;  %vm158_vm7 = vc.u32 %v978_v7, %v981_v8  ;;  %v159_v25 = vadd.s32 1, %v982_v9 }
  0xba   :  { %v231_v26 = vshrl.u32 %v845_v40, %v219_v13  ;;  %v233_v27 = vshll.u32 %v845_v40, %v218_v1  ;;  %v223_v29 = vor.u32 %v222_v20, %v221_v17  ;;  %v226_v31 = vor.u32 %v225_v21, %v224_v18 }
  0xbb   :  { %v229_v32 = vor.u32 %v228_v22, %v227_v19  ;;  %v234_v33 = vshrl.u32 %v846_v47, %v219_v13  ;;  %v160_v28 = vsel %vm158_vm7, %v159_v25, %v982_v9  ;;  %vm236_vm8 = vcmp.lt.s32.totalorder %v217_v10, 1 }
  0xbc   :  { %v232_v35 = vor.u32 %v231_v26, %v230_v24  ;;  %vm239_vm9 = vcmp.lt.s32.totalorder %v217_v10, 4  ;;  %v161_v34 = vadd.s32 %v160_v28, %v156_v15  ;;  %vm238_vm10 = vcmp.lt.s32.totalorder %v217_v10, 3 }
  0xbd   :  { %v235_v36 = vor.u32 %v234_v33, %v233_v27  ;;  %v241_v37 = vsel %vm239_vm9, %v229_v32, 2102212464  ;;  %v220_v38 = vshrl.u32 %v841_v30, %v219_v13  ;;  %v244_v39 = vsel %vm236_vm8, %v223_v29, %v226_v31 }
  0xbe   :  { %v245_v41 = vsel %vm239_vm9, %v232_v35, 920167782  ;;  %v248_v42 = vsel %vm236_vm8, %v226_v31, %v229_v32  ;;  %v162_v43 = vadd.s32 536870912, %v161_v34  ;;  %vm237_vm11 = vcmp.lt.s32.totalorder %v217_v10, 2 }
  0xbf   :  { %v246_v40 = vsel %vm238_vm10, %v229_v32, %v245_v41  ;;  %v249_v44 = vsel %vm239_vm9, %v235_v36, 1326507024  ;;  %v240_v45 = vsel %vm236_vm8, %v220_v38, %v223_v29  ;;  %v242_v46 = vsel %vm238_vm10, %v226_v31, %v241_v37 }
  0xc0   :  { %v247_v47 = vsel %vm237_vm11, %v244_v39, %v246_v40  ;;  %v250_v48 = vsel %vm238_vm10, %v232_v35, %v249_v44  ;;  %v992_v49 = vshrl.u32 %v162_v43, 30  ;;  %v243_v55 = vsel %vm237_vm11, %v240_v45, %v242_v46 }
  0xc1   :  { %v251_v50 = vsel %vm237_vm11, %v248_v42, %v250_v48  ;;  %v994_v51 = vmul.u32.u64.low %v252_v14, %v247_v47  ;;  %v995_v52 = vmul.u32.u64.high %v252_v14, %v247_v47, %v994_v51  ;;  %v259_v58 = vmul.u32 %v252_v14, %v243_v55 }
  0xc2   :  { %v997_v53 = vmul.u32.u64.low %v252_v14, %v251_v50  ;;  %v998_v54 = vmul.u32.u64.high %v252_v14, %v251_v50, %v997_v53  ;;  %v164_v30 = vshll.u32 %v992_v49, 30  ;;  %v157_v9 = vadd.s32 %v981_v8, %v978_v7 }
  0xc3   :  { %v262_v57 = vadd.s32 1, %v995_v52  ;;  %vm206_vm2 = vcmp.lt.s32.totalorder %v958_v16, 0  ;;  %v187_v12 = vsub.s32 4, %v992_v49  ;;  %vm205_vm3 = vcmp.le.f32.partialorder %v204_v23, 0.7853982 }
  0xc4   :  { %v165_v56 = vsub.s32 %v161_v34, %v164_v30  ;;  %vm261_vm12 = vc.u32 %v998_v54, %v994_v51  ;;  %v260_v32 = vadd.s32 %v994_v51, %v998_v54  ;;  %vm193_vm10 = vweird.f32 %v954_v11 }
  0xc5   :  { %v263_v60 = vsel %vm261_vm12, %v262_v57, %v995_v52  ;;  %v188_v50 = vsel %vm103_vm15, %v187_v12, %v992_v49  ;;  %vm296_vm11 = vweird.f32 %v958_v16  ;;  %vm347_vm12 = vcmask 523264  }
  0xc6   :  { %v167_v59 = vsub.s32 0, %v165_v56  ;;  %v264_v61 = vadd.s32 %v263_v60, %v259_v58  ;;  %v190_v52 = vsel %vm1012_vm1, 0, %v188_v50 }
  0xc7   :  { %v194_v55 = vand.u32 3, %v190_v52 }
  0xc8   :  { %v641_v62 = vmin.u32 %v167_v59, %v165_v56  ;;  %v265_v63 = vadd.s32 536870912, %v264_v61 }
  0xc9   :  { %vm196_vm4 = vcmp.eq.s32.totalorder %v194_v55, 0  ;;  %vm199_vm5 = vcmp.eq.s32.totalorder %v194_v55, 2  ;;  %vm195_vm6 = vcmp.lt.s32.totalorder %v194_v55, 2  ;;  %v565_v55 = vld [vmem:[%s1090_s10] sm:$0xf] }
  0xca   :  { %v169_v0 = vclz %v641_v62  ;;  %v266_v1 = vshrl.u32 %v265_v63, 30 }
  0xcc   :  { %v642_v2 = vadd.s32 4294967294, %v169_v0  ;;  %v267_v3 = vshll.u32 %v266_v1, 30  ;;  %v290_v48 = vsub.s32 4, %v266_v1 }
  0xce   :  { %vm643_vm13 = vcmp.lt.s32.totalorder %v642_v2, 0  ;;  %v268_v6 = vsub.s32 %v264_v61, %v267_v3  ;;  %v291_v53 = vsel %vm206_vm2, %v290_v48, %v266_v1 }
  0xcf   :  { %v172_v5 = vsel %vm643_vm13, 0, %v642_v2  ;;  %v293_v30 = vsel %vm205_vm3, 0, %v291_v53 }
  0xd0   :  { %v173_v10 = vsub.s32 32, %v172_v5  ;;  %v177_v13 = vsub.s32 4294967266, %v172_v5  ;;  %v270_v14 = vsub.s32 0, %v268_v6  ;;  %v174_v15 = vshll.u32 %v165_v56, %v172_v5 }
  0xd1   :  { %v297_v57 = vand.u32 3, %v293_v30 }
  0xd2   :  { %v175_v17 = vshrl.u32 %v157_v9, %v173_v10  ;;  %v178_v18 = vadd.s32 127, %v177_v13  ;;  %v645_v19 = vmin.u32 %v270_v14, %v268_v6  ;;  %v746_v9 = vld [vmem:[%s1086_s6 + $0x10] sm:$0xff]   ;;  %v648_v10 = vld [vmem:[#allocation7] ss:$0 sm:$0xff] }
  0xd3   :  { %vm302_vm7 = vcmp.eq.s32.totalorder %v297_v57, 2  ;;  %vm299_vm8 = vcmp.eq.s32.totalorder %v297_v57, 0  ;;  %vm298_vm9 = vcmp.lt.s32.totalorder %v297_v57, 2  ;;  %695 = vmatpush3.bf16.msra.mxu1 %v746_v9 }
  0xd4   :  { %v176_v20 = vor.u32 %v175_v17, %v174_v15  ;;  %v179_v21 = vshll.u32 %v178_v18, 23  ;;  %v272_v22 = vclz %v645_v19  ;;  %696 = vmatprep.subr.bf16.mxu1 %v839_v4  ;;  %v394_v15 = vstv %s78_s0 }
  0xd6   :  { %v180_v24 = vor.u32 4788187, %v179_v21  ;;  %v646_v25 = vadd.s32 4294967294, %v272_v22  ;;  %v183_v27 = vcvt.s32.f32 %v176_v20 }
  0xd8   :  { %v181_v26 = vand.u32 2147483647, %v180_v24  ;;  %vm647_vm14 = vcmp.lt.s32.totalorder %v646_v25, 0 }
  0xd9   :  { %v275_v31 = vsel %vm647_vm14, 0, %v646_v25 }
  0xda   :  { %v184_v29 = vmul.f32 %v183_v27, %v181_v26  ;;  %v276_v7 = vsub.s32 32, %v275_v31  ;;  %v280_v8 = vsub.s32 4294967266, %v275_v31  ;;  %v277_v28 = vshll.u32 %v268_v6, %v275_v31  ;;  %v749_v27 = vld [vmem:[%s1088_s8 + $0x8] sm:$0xff]   ;;  %v654_v31 = vld [vmem:[%s1087_s7] ss:$0 sm:$0xff] }
  0xdc   :  { %v185_v33 = vxor.u32 2147483648, %v184_v29  ;;  %v278_v35 = vshrl.u32 %v260_v32, %v276_v7  ;;  %v281_v34 = vadd.s32 127, %v280_v8 }
  0xde   :  { %v186_v36 = vsel %vm103_vm15, %v185_v33, %v184_v29  ;;  %v279_v38 = vor.u32 %v278_v35, %v277_v28  ;;  %v282_v39 = vshll.u32 %v281_v34, 23  ;;  %v750_v29 = vld [vmem:[%s1088_s8] sm:$0xff]  }
  0xdf   :  { %v189_v41 = vsel %vm1012_vm1, %v954_v11, %v186_v36  ;;  %v747_v11 = vld [vmem:[%s1086_s6 + $0x8] sm:$0xff]   ;;  %v483_v34 = vld [vmem:[%s1083_s3] sm:$0xff] }
  0xe0   :  { %v283_v42 = vor.u32 4788187, %v282_v39  ;;  %751 = vcosq.f32 %v189_v41  ;;  %v286_v40 = vcvt.s32.f32 %v279_v38  ;;  %697 = vmatpush3.bf16.msra.mxu1 %v747_v11 }
  0xe1   :  { %753 = vsinq.f32 %v189_v41  ;;  %698 = vmatprep.subr.bf16.mxu1 %v839_v4 }
  0xe2   :  { %v284_v43 = vand.u32 2147483647, %v283_v42  ;;  %v567_v42 = vld [vmem:[%s1091_s11] sm:$0xff] }
  0xe3   :  { %570 = vperm.xlu1 %740, %v567_v42  }
  0xe4   :  { %v287_v44 = vmul.f32 %v286_v40, %v284_v43  ;;  %v660_v43 = vld [vmem:[%s1089_s9] ss:$0 sm:$0xff]  ;;  %s847_s9 = smov [#allocation9]  }
  0xe5   :  { %s627_s24 = sshll.u32 %s847_s9, 4  ;;  %s628_s24 = int_to_ptr.vmem [resolvable:$true] %s627_s24 }
  0xe6   :  { %v288_v45 = vxor.u32 2147483648, %v287_v44  ;;  %s807_s25 = scalar_lea.vmem %s628_s24, 128  ;;  %p812_p11 = scmp.lt.s32.totalorder %s628_s24, %s628_s24 }
  0xe7   :  { %p808_p10 = scmp.ne.s32.totalorder %s628_s24, %s807_s25  ;;  %p813_p12 = scmp.lt.s32.totalorder %s807_s25, %s807_s25 }
  0xe8   :  { %v289_v46 = vsel %vm206_vm2, %v288_v45, %v287_v44  ;;  %v560_v45 = vstv %s638_s22  ;;  %vm619_vm2 = vcmask 130048  }
  0xe9   :  { %v292_v47 = vsel %vm205_vm3, %v958_v16, %v289_v46  ;;  %v748_v16 = vld [vmem:[%s1086_s6] sm:$0xff]   ;;  %p814_p13 = por %p813_p12, %p812_p11 }
  0xea   :  { %755 = vcosq.f32 %v292_v47  ;;  %699 = vmatpush3.bf16.msra.mxu1 %v748_v16 }
  0xeb   :  { %757 = vsinq.f32 %v292_v47  ;;  %712 = vmatprep.subr.bf16.mxu1 %v839_v4  ;;  %p815_p0 = pnand %p814_p13, %p808_p10 }
  0xed   :  { %v752_v51 = vpop.eup %751 }
  0xee   :  { %v754_v54 = vpop.eup %753  ;;  %v200_v23 = vxor.u32 2147483648, %v752_v51 }
  0xef   :  { %v197_v56 = vxor.u32 2147483648, %v754_v54 }
  0xf0   :  { %v201_v60 = vsel %vm199_vm5, %v200_v23, %v754_v54 }
  0xf1   :  { %v198_v59 = vsel %vm196_vm4, %v752_v51, %v197_v56 }
  0xf2   :  { %v202_v63 = vsel %vm195_vm6, %v198_v59, %v201_v60 }
  0xf3   :  { %v203_v3 = vsel %vm193_vm10, nan, %v202_v63 }
  0xf7   :  { %v756_v58 = vpop.eup %755 }
  0xf8   :  { %v758_v61 = vpop.eup %757  ;;  %v303_v62 = vxor.u32 2147483648, %v756_v58 }
  0xf9   :  { %v300_v49 = vxor.u32 2147483648, %v758_v61 }
  0xfa   :  { %v304_v0 = vsel %vm302_vm7, %v303_v62, %v758_v61 }
  0xfb   :  { %v301_v1 = vsel %vm299_vm8, %v756_v58, %v300_v49 }
  0xfc   :  { %v305_v2 = vsel %vm298_vm9, %v301_v1, %v304_v0 }
  0xfd   :  { %v306_v5 = vsel %vm296_vm11, nan, %v305_v2 }
  0xfe   :  { %v307_v6 = vpack.c.bf16 %v306_v5, %v203_v3 }
 0x100   :  { %689 = vmatmul.mubr.msk.bf16.vlgmr.msra.gmra.mxu0 %vm347_vm12, %v307_v6 }
 0x101   :  { %708 = vmatprep.mubr.msk.bf16.mxu0 %vm840_vm0, %v839_v4  ;;  %705 = vmatpush3.bf16.msra.mxu0 %v749_v27 }
 0x102   :  { %706 = vmatprep.subr.bf16.mxu0 %v839_v4 }
 0x105   :  { %707 = vmatpush3.bf16.msra.mxu0 %v750_v29 }
 0x15e   :  { %v571_v56 = vpop.permute.xlu1 %570 }
 0x1c0   :  { %v385_v13 = vpop.f32.mrf.mxu0 }
 0x1c1   :  { %v386_v14 = vadd.f32 %v648_v10, %v385_v13 }
 0x1c2   :  { %v690_v17 = vpop.f32.mrf.mxu0 }
 0x1c3   :  { %v395_v19 = vmul.f32 %v394_v15, %v386_v14  ;;  %vm392_vm13 = vcmp.ge.f32.partialorder %v386_v14, 0.0 }
 0x1c4   :  { %v388_v18 = vpop.f32.mrf.mxu0 }
 0x1c5   :  { %v389_v20 = vadd.f32 %v648_v10, %v388_v18  ;;  %v397_v24 = vsel %vm392_vm13, %v386_v14, %v395_v19 }
 0x1c6   :  { %v691_v21 = vpop.f32.mrf.mxu0 }
 0x1c7   :  { %vm393_vm14 = vcmp.ge.f32.partialorder %v389_v20, 0.0  ;;  %v396_v22 = vmul.f32 %v394_v15, %v389_v20 }
 0x1c9   :  { %v398_v25 = vsel %vm393_vm14, %v389_v20, %v396_v22 }
 0x1ca   :  { %v399_v26 = vpack.c.bf16 %v398_v25, %v397_v24 }
 0x1cc   :  { %701 = vmatmul.mubr.msk.bf16.vlgmr.msra.gmra.mxu1 %vm347_vm12, %v399_v26 }
 0x1cd   :  { %714 = vmatprep.mubr.msk.bf16.mxu1 %vm840_vm0, %v839_v4  ;;  %v484_v4 = vld [vmem:[%s1083_s3 + $0x8] sm:$0xff]  ;;  %vm513_vm0 = vcmask 261120  }
 0x28c   :  { %v476_v32 = vpop.f32.mrf.mxu1 }
 0x28d   :  { %v477_v7 = vadd.f32 %v654_v31, %v476_v32 }
 0x28e   :  { %v702_v8 = vpop.f32.mrf.mxu1 }
 0x28f   :  { %v485_v28 = vadd.f32 1.0, %v477_v7 }
 0x290   :  { %v479_v33 = vpop.f32.mrf.mxu1 }
 0x291   :  { %v480_v35 = vadd.f32 %v654_v31, %v479_v33  ;;  %v487_v38 = vmul.f32 %v485_v28, %v483_v34 }
 0x292   :  { %v703_v36 = vpop.f32.mrf.mxu1 }
 0x293   :  { %v486_v37 = vadd.f32 1.0, %v480_v35 }
 0x295   :  { %v488_v39 = vmul.f32 %v486_v37, %v484_v4 }
 0x297   :  { %v489_v41 = vpack.c.bf16 %v488_v39, %v487_v38 }
 0x299   :  { %709 = vmatmul.mubr.msk.bf16.vlgmr.msra.gmra.mxu0 %vm513_vm0, %v489_v41 }
 0x359   :  { %v551_v40 = vpop.f32.mrf.mxu0 }
 0x35a   :  { %v552_v44 = vadd.f32 %v660_v43, %v551_v40 }
 0x35b   :  { %v710_v12 = vpop.f32.mrf.mxu0 }
 0x35c   :  { %v561_v47 = vmul.f32 %v560_v45, %v552_v44  ;;  %vm558_vm15 = vcmp.ge.f32.partialorder %v552_v44, 0.0 }
 0x35d   :  { %v554_v46 = vpop.f32.mrf.mxu0 }
 0x35e   :  { %v555_v48 = vadd.f32 %v660_v43, %v554_v46  ;;  %v563_v52 = vsel %vm558_vm15, %v552_v44, %v561_v47 }
 0x35f   :  { %v711_v50 = vpop.f32.mrf.mxu0 }
 0x360   :  { %vm559_vm1 = vcmp.ge.f32.partialorder %v555_v48, 0.0  ;;  %v562_v51 = vmul.f32 %v560_v45, %v555_v48 }
 0x362   :  { %v564_v53 = vsel %vm559_vm1, %v555_v48, %v562_v51 }
 0x363   :  { %v566_v54 = vpack.c.bf16 %v564_v53, %v563_v52 }
 0x365   :  { %v577_v30 = vsel %vm513_vm0, %v566_v54, 0 }
 0x366   :  { %713 = vmatpush3.bf16.xpose.msra.mxu1 %v577_v30 }
 0x36d   :  { %715 = vmatmul.mubr.msk.bf16.vlgmr.msra.gmra.mxu1 %vm513_vm0, %v565_v55 }
 0x42d   :  { %v613_v23 = vpop.f32.mrf.mxu1 }
 0x42e   :  { %v614_v57 = vadd.f32 %v613_v23, %v571_v56 }
 0x42f   :  { %v716_v58 = vpop.f32.mrf.mxu1 }
 0x430   :  { %620 = vst.msk [vmem:[#allocation9] sm:$0xff] %vm619_vm2, %v614_v57 }
 0x431   :  { %v616_v59 = vpop.f32.mrf.mxu1 }
 0x432   :  { %818 = shalt.err (!%p815_p0)
}
 0x433   :  { %630 = dma.vmem_to_hbm [thread:$0]  %s628_s24, 128, %s1092_s12, [#allocation4]   ;;  %v717_v60 = vpop.f32.mrf.mxu1 }
 0x434   :  { %833 = dma.done.wait [#allocation4], 128  }
 0x435   :  { %834 = vsyncadd [#allocation4], 4294967168 }
 0x436   :  { %634 = vsyncpa [#allocation3], 1 }
 0x437   :  { %635 = vsyncpa [#allocation8], 1 }
 0x438   :  { %636 = vsyncpa [#allocation4], 1 }
 0x439   :  { %637 = vsyncpa [#allocation5], 1 }

</bundles_post_ra>
